<compile_context>
chip_gen: v7x
topology: tpu7x:2x2x1
jax: 0.10.0
libtpu: 0.0.40
codegen_flags: <defaults>
</compile_context>

<pallas_src>
import numpy as np
import jax
import jax.numpy as jnp
from jax import lax
from jax.experimental import pallas as pl
from jax.experimental.pallas import tpu as pltpu


# ---------------------------------------------------------------------------
# Prepare-time helpers (run once, outside the hot jitted path)
# ---------------------------------------------------------------------------
def _fold_bn(bias, gamma, beta, mean, var, eps=1e-5):
    """Fold conv bias + inference BatchNorm into (scale, shift)."""
    s = gamma * lax.rsqrt(var + eps)
    return s, (bias - mean) * s + beta


def _conv_w_to_toeplitz(w, width):
    """w: (3, 3, Cin, Cout) HWIO -> (3, width*Cin, width*Cout).

    Folds the kx taps and the zero-padding along W into a block-banded weight
    so a full conv row is one lane-dense matmul per ky tap.
    """
    kh, kw, cin, cout = w.shape
    sel = np.zeros((kw, width, width), np.float32)     # sel[kx, wi, wo]
    for kx in range(kw):
        for wo in range(width):
            wi = wo + kx - 1                            # pad = 1
            if 0 <= wi < width:
                sel[kx, wi, wo] = 1.0
    t = jnp.einsum("ykio,kpq->ypiqo", w.astype(jnp.float32), jnp.asarray(sel))
    return t.reshape(kh, width * cin, width * cout)


def prepare_inconv(params, width):
    """Fold BN into the conv weights and build bf16 Toeplitz operands."""
    cin, cout = params["w1"].shape[2], params["w1"].shape[3]
    # Zero-pad Cin so the packed lane width W*Cin fills a 128-lane tile.
    cin_p = max(cin, -(-128 // width))

    s1, sh1 = _fold_bn(params["b1"], params["g1"], params["be1"],
                       params["m1"], params["v1"])
    s2, sh2 = _fold_bn(params["b2"], params["g2"], params["be2"],
                       params["m2"], params["v2"])

    # BN scale is per-output-channel -> fold straight into the conv weights.
    w1 = params["w1"] * s1[None, None, None, :]
    w2 = params["w2"] * s2[None, None, None, :]
    w1 = jnp.pad(w1, ((0, 0), (0, 0), (0, cin_p - cin), (0, 0)))

    t1 = _conv_w_to_toeplitz(w1, width).astype(jnp.bfloat16)   # (3, W*Cin_p, W*Cout)
    t2 = _conv_w_to_toeplitz(w2, width).astype(jnp.bfloat16)   # (3, W*Cout,  W*Cout)
    h1t = jnp.tile(sh1, width).reshape(1, width * cout).astype(jnp.float32)
    h2t = jnp.tile(sh2, width).reshape(1, width * cout).astype(jnp.float32)
    return t1, t2, h1t, h2t


# ---------------------------------------------------------------------------
# Fused double-conv kernel (one grid step per batch sample)
# ---------------------------------------------------------------------------
def _double_conv_kernel(x_ref, w1_ref, w2_ref, h1_ref, h2_ref, o_ref, acc_ref):
    # x_ref : (1, H, W*Cin_p)  bf16, channels packed on lanes (lane = w*C + c)
    # w*_ref: (3, K, W*Cout)   bf16 Toeplitz weights, BN scale pre-folded
    # h*_ref: (1, W*Cout)      f32 folded BN shift
    # o_ref : (1, H, W*Cout)
    # acc_ref: VMEM (H, W*Cout) f32 accumulator (reused for both stages)
    h = o_ref.shape[1]
    x = x_ref[0]

    # ---- conv1: one full-width dot per ky tap; H halo = shifted adds -------
    d0 = jnp.dot(x, w1_ref[0], preferred_element_type=jnp.float32)
    d1 = jnp.dot(x, w1_ref[1], preferred_element_type=jnp.float32)
    d2 = jnp.dot(x, w1_ref[2], preferred_element_type=jnp.float32)
    acc_ref[...] = d1
    acc_ref[1:h, :] += d0[0:h - 1, :]
    acc_ref[0:h - 1, :] += d2[1:h, :]
    # BN shift + ReLU in f32, then down-cast for the second MXU stage.
    y1 = jnp.maximum(acc_ref[...] + h1_ref[...], 0.0).astype(jnp.bfloat16)

    # ---- conv2 (intermediate never leaves VMEM) -----------------------------
    e0 = jnp.dot(y1, w2_ref[0], preferred_element_type=jnp.float32)
    e1 = jnp.dot(y1, w2_ref[1], preferred_element_type=jnp.float32)
    e2 = jnp.dot(y1, w2_ref[2], preferred_element_type=jnp.float32)
    acc_ref[...] = e1
    acc_ref[1:h, :] += e0[0:h - 1, :]
    acc_ref[0:h - 1, :] += e2[1:h, :]
    o_ref[0] = jnp.maximum(acc_ref[...] + h2_ref[...], 0.0).astype(o_ref.dtype)


# ---------------------------------------------------------------------------
# Wrapper: PyTorch-convention NCHW in / NCHW out
# ---------------------------------------------------------------------------
def inconv_forward(t1, t2, h1t, h2t, x_nchw):
    n, cin, hgt, wid = x_nchw.shape
    lanes_in = t1.shape[1]          # W * Cin_p
    lanes_out = t1.shape[2]         # W * Cout
    cin_p = lanes_in // wid
    cout = lanes_out // wid

    # NCHW -> pad Cin -> NHWC -> (N, H, W*Cin_p); final reshape is row-major free.
    xp = jnp.pad(x_nchw, ((0, 0), (0, cin_p - cin), (0, 0), (0, 0)))
    xr = jnp.transpose(xp, (0, 2, 3, 1)).reshape(n, hgt, lanes_in)
    xr = xr.astype(jnp.bfloat16)

    # Advisory cost for XLA scheduling around the custom call.
    flops = 2 * n * 3 * hgt * (lanes_in * lanes_out + lanes_out * lanes_out)
    bytes_accessed = (xr.size * 2 + t1.size * 2 + t2.size * 2
                      + (h1t.size + h2t.size) * 4
                      + n * hgt * lanes_out * 4)
    cost = pl.CostEstimate(flops=flops, transcendentals=0,
                           bytes_accessed=bytes_accessed)

    # VMEM budget from actual buffer math (double-buffered in/out blocks,
    # weights, shifts, accumulator scratch) with 2x headroom, 4 MiB floor.
    vmem_bytes = (2 * hgt * lanes_in * 2          # x block, bf16, double-buffered
                  + 2 * hgt * lanes_out * 4       # out block, f32, double-buffered
                  + 2 * (t1.size + t2.size) * 2   # Toeplitz weights, bf16
                  + 2 * (h1t.size + h2t.size) * 4 # shifts
                  + hgt * lanes_out * 4)          # accumulator scratch
    vmem_limit = int(min(max(2 * vmem_bytes, 4 * 1024 * 1024), 64 * 1024 * 1024))

    out = pl.pallas_call(
        _double_conv_kernel,
        out_shape=jax.ShapeDtypeStruct((n, hgt, lanes_out), x_nchw.dtype),
        grid=(n,),
        in_specs=[
            pl.BlockSpec((1, hgt, lanes_in), lambda b: (b, 0, 0)),
            pl.BlockSpec(t1.shape, lambda b: (0, 0, 0)),
            pl.BlockSpec(t2.shape, lambda b: (0, 0, 0)),
            pl.BlockSpec((1, lanes_out), lambda b: (0, 0)),
            pl.BlockSpec((1, lanes_out), lambda b: (0, 0)),
        ],
        out_specs=pl.BlockSpec((1, hgt, lanes_out), lambda b: (b, 0, 0)),
        scratch_shapes=[pltpu.VMEM((hgt, lanes_out), jnp.float32)],
        compiler_params=pltpu.CompilerParams(
            dimension_semantics=("parallel",),
            vmem_limit_bytes=vmem_limit,
        ),
        cost_estimate=cost,
    )(xr, t1, t2, h1t, h2t)

    # (N, H, W*Cout) -> NCHW
    return jnp.transpose(out.reshape(n, hgt, wid, cout), (0, 3, 1, 2))


# ---------------------------------------------------------------------------
# Deterministic parameters + pure-JAX reference
# ---------------------------------------------------------------------------
def init_inconv_params(key, in_ch, out_ch):
    ks = jax.random.split(key, 10)
    return {
        "w1": 0.1 * jax.random.normal(ks[0], (3, 3, in_ch, out_ch), jnp.float32),
        "b1": 0.1 * jax.random.normal(ks[1], (out_ch,), jnp.float32),
        "g1": 1.0 + 0.1 * jax.random.normal(ks[2], (out_ch,), jnp.float32),
        "be1": 0.1 * jax.random.normal(ks[3], (out_ch,), jnp.float32),
        "m1": 0.1 * jax.random.normal(ks[4], (out_ch,), jnp.float32),
        "v1": 1.0 + 0.1 * jax.random.uniform(ks[5], (out_ch,), jnp.float32),
        "w2": 0.1 * jax.random.normal(ks[6], (3, 3, out_ch, out_ch), jnp.float32),
        "b2": 0.1 * jax.random.normal(ks[7], (out_ch,), jnp.float32),
        "g2": 1.0 + 0.1 * jax.random.normal(ks[8], (out_ch,), jnp.float32),
        "be2": 0.1 * jax.random.normal(ks[9], (out_ch,), jnp.float32),
        "m2": jnp.zeros((out_ch,), jnp.float32),
        "v2": jnp.ones((out_ch,), jnp.float32),
    }


def inconv_reference(params, x_nchw):
    s1, sh1 = _fold_bn(params["b1"], params["g1"], params["be1"],
                       params["m1"], params["v1"])
    s2, sh2 = _fold_bn(params["b2"], params["g2"], params["be2"],
                       params["m2"], params["v2"])

    def block(x, w, s, sh):
        y = lax.conv_general_dilated(
            x, w, window_strides=(1, 1), padding=((1, 1), (1, 1)),
            dimension_numbers=("NCHW", "HWIO", "NCHW"),
            precision=lax.Precision.HIGHEST)
        return jnp.maximum(y * s[None, :, None, None] + sh[None, :, None, None], 0.0)

    return block(block(x_nchw, params["w1"], s1, sh1), params["w2"], s2, sh2)


if __name__ == "__main__":
    key = jax.random.PRNGKey(0)
    k_x, k_p = jax.random.split(key)

    # inconv(in_ch=4, out_ch=8) on a (2, 4, 16, 16) input
    in_ch, out_ch = 4, 8
    N, H, W = 2, 16, 16
    x = jax.random.normal(k_x, (N, in_ch, H, W), jnp.float32)
    params = init_inconv_params(k_p, in_ch, out_ch)

    # Weight folding / Toeplitz construction happens once, outside the hot jit.
    t1, t2, h1t, h2t = prepare_inconv(params, W)

    out = jax.block_until_ready(jax.jit(inconv_forward)(t1, t2, h1t, h2t, x))
    assert out.shape == (N, out_ch, H, W), out.shape

    ref = jax.block_until_ready(jax.jit(inconv_reference)(params, x))
    max_err = float(jnp.max(jnp.abs(out - ref)))
    # bf16 operands with f32 accumulation over two stacked convs.
    assert max_err < 5e-2, max_err

    print("KERNEL_OK")
</pallas_src>

<mosaic_0001>
module attributes {stable_mosaic.version = 11 : i64} {
  func.func @_double_conv_kernel(%arg0: i32, %arg1: memref<1x16x128xbf16, #tpu.memory_space<vmem>>, %arg2: memref<3x128x128xbf16, #tpu.memory_space<vmem>>, %arg3: memref<3x128x128xbf16, #tpu.memory_space<vmem>>, %arg4: memref<1x128xf32, #tpu.memory_space<vmem>>, %arg5: memref<1x128xf32, #tpu.memory_space<vmem>>, %arg6: memref<1x16x128xf32, #tpu.memory_space<vmem>>, %arg7: memref<16x128xf32, #tpu.memory_space<vmem>>) attributes {dimension_semantics = [#tpu.dimension_semantics<parallel>], iteration_bounds = array<i64: 2>, scalar_prefetch = 0 : i64, scratch_operands = 1 : i64, tpu.core_type = #tpu.core_type<tc>, window_params = [{transform_indices = @transform_0, window_bounds = array<i64: 1, 16, 128>}, {pipeline_mode = #tpu.pipeline_mode<synchronous>, transform_indices = @transform_1, window_bounds = array<i64: 3, 128, 128>}, {pipeline_mode = #tpu.pipeline_mode<synchronous>, transform_indices = @transform_2, window_bounds = array<i64: 3, 128, 128>}, {pipeline_mode = #tpu.pipeline_mode<synchronous>, transform_indices = @transform_3, window_bounds = array<i64: 1, 128>}, {pipeline_mode = #tpu.pipeline_mode<synchronous>, transform_indices = @transform_4, window_bounds = array<i64: 1, 128>}, {transform_indices = @transform_5, window_bounds = array<i64: 1, 16, 128>}]} {
    %c0 = arith.constant 0 : index
    %c0_0 = arith.constant 0 : index
    %c0_1 = arith.constant 0 : index
    %0 = vector.load %arg1[%c0, %c0_0, %c0_1] : memref<1x16x128xbf16, #tpu.memory_space<vmem>>, vector<1x16x128xbf16>
    %1 = vector.shape_cast %0 : vector<1x16x128xbf16> to vector<16x128xbf16>
    %c0_2 = arith.constant 0 : index
    %c0_3 = arith.constant 0 : index
    %c0_4 = arith.constant 0 : index
    %2 = vector.load %arg2[%c0_2, %c0_3, %c0_4] : memref<3x128x128xbf16, #tpu.memory_space<vmem>>, vector<1x128x128xbf16>
    %3 = vector.shape_cast %2 : vector<1x128x128xbf16> to vector<128x128xbf16>
    %cst = arith.constant dense<0.000000e+00> : vector<16x128xf32>
    %4 = tpu.matmul %1, %3, %cst {dimension_numbers = #tpu.dot_dimension_numbers<[1], [0], [0], [1], [0, 0, 1, 1], [], []>} : vector<16x128xbf16>, vector<128x128xbf16>, vector<16x128xf32> -> vector<16x128xf32>
    %c1 = arith.constant 1 : index
    %c0_5 = arith.constant 0 : index
    %c0_6 = arith.constant 0 : index
    %5 = vector.load %arg2[%c1, %c0_5, %c0_6] : memref<3x128x128xbf16, #tpu.memory_space<vmem>>, vector<1x128x128xbf16>
    %6 = vector.shape_cast %5 : vector<1x128x128xbf16> to vector<128x128xbf16>
    %cst_7 = arith.constant dense<0.000000e+00> : vector<16x128xf32>
    %7 = tpu.matmul %1, %6, %cst_7 {dimension_numbers = #tpu.dot_dimension_numbers<[1], [0], [0], [1], [0, 0, 1, 1], [], []>} : vector<16x128xbf16>, vector<128x128xbf16>, vector<16x128xf32> -> vector<16x128xf32>
    %c2 = arith.constant 2 : index
    %c0_8 = arith.constant 0 : index
    %c0_9 = arith.constant 0 : index
    %8 = vector.load %arg2[%c2, %c0_8, %c0_9] : memref<3x128x128xbf16, #tpu.memory_space<vmem>>, vector<1x128x128xbf16>
    %9 = vector.shape_cast %8 : vector<1x128x128xbf16> to vector<128x128xbf16>
    %cst_10 = arith.constant dense<0.000000e+00> : vector<16x128xf32>
    %10 = tpu.matmul %1, %9, %cst_10 {dimension_numbers = #tpu.dot_dimension_numbers<[1], [0], [0], [1], [0, 0, 1, 1], [], []>} : vector<16x128xbf16>, vector<128x128xbf16>, vector<16x128xf32> -> vector<16x128xf32>
    %c0_11 = arith.constant 0 : index
    %c0_12 = arith.constant 0 : index
    %11 = vector.load %arg7[%c0_11, %c0_12] : memref<16x128xf32, #tpu.memory_space<vmem>>, vector<16x128xf32>
    tpu.vector_store %arg7[%c0_11, %c0_12], %7 {strides = array<i32>} : memref<16x128xf32, #tpu.memory_space<vmem>>, vector<16x128xf32>,
    %c1_13 = arith.constant 1 : index
    %c0_14 = arith.constant 0 : index
    %12 = vector.load %arg7[%c1_13, %c0_14] : memref<16x128xf32, #tpu.memory_space<vmem>>, vector<15x128xf32>
    %13 = vector.extract_strided_slice %4 {offsets = [0, 0], sizes = [15, 128], strides = [1, 1]} : vector<16x128xf32> to vector<15x128xf32>
    %14 = arith.addf %12, %13 : vector<15x128xf32>
    %c1_15 = arith.constant 1 : index
    %c0_16 = arith.constant 0 : index
    %15 = vector.load %arg7[%c1_15, %c0_16] : memref<16x128xf32, #tpu.memory_space<vmem>>, vector<15x128xf32>
    tpu.vector_store %arg7[%c1_15, %c0_16], %14 {strides = array<i32>} : memref<16x128xf32, #tpu.memory_space<vmem>>, vector<15x128xf32>,
    %c0_17 = arith.constant 0 : index
    %c0_18 = arith.constant 0 : index
    %16 = vector.load %arg7[%c0_17, %c0_18] : memref<16x128xf32, #tpu.memory_space<vmem>>, vector<15x128xf32>
    %17 = vector.extract_strided_slice %10 {offsets = [1, 0], sizes = [15, 128], strides = [1, 1]} : vector<16x128xf32> to vector<15x128xf32>
    %18 = arith.addf %16, %17 : vector<15x128xf32>
    %c0_19 = arith.constant 0 : index
    %c0_20 = arith.constant 0 : index
    %19 = vector.load %arg7[%c0_19, %c0_20] : memref<16x128xf32, #tpu.memory_space<vmem>>, vector<15x128xf32>
    tpu.vector_store %arg7[%c0_19, %c0_20], %18 {strides = array<i32>} : memref<16x128xf32, #tpu.memory_space<vmem>>, vector<15x128xf32>,
    %c0_21 = arith.constant 0 : index
    %c0_22 = arith.constant 0 : index
    %20 = vector.load %arg7[%c0_21, %c0_22] : memref<16x128xf32, #tpu.memory_space<vmem>>, vector<16x128xf32>
    %c0_23 = arith.constant 0 : index
    %c0_24 = arith.constant 0 : index
    %21 = vector.load %arg4[%c0_23, %c0_24] : memref<1x128xf32, #tpu.memory_space<vmem>>, vector<1x128xf32>
    %22 = vector.broadcast %21 : vector<1x128xf32> to vector<16x128xf32>
    %23 = arith.addf %20, %22 : vector<16x128xf32>
    %cst_25 = arith.constant 0.000000e+00 : f32
    %24 = vector.broadcast %cst_25 : f32 to vector<16x128xf32>
    %25 = arith.maximumf %23, %24 : vector<16x128xf32>
    %26 = arith.truncf %25 : vector<16x128xf32> to vector<16x128xbf16>
    %c0_26 = arith.constant 0 : index
    %c0_27 = arith.constant 0 : index
    %c0_28 = arith.constant 0 : index
    %27 = vector.load %arg3[%c0_26, %c0_27, %c0_28] : memref<3x128x128xbf16, #tpu.memory_space<vmem>>, vector<1x128x128xbf16>
    %28 = vector.shape_cast %27 : vector<1x128x128xbf16> to vector<128x128xbf16>
    %cst_29 = arith.constant dense<0.000000e+00> : vector<16x128xf32>
    %29 = tpu.matmul %26, %28, %cst_29 {dimension_numbers = #tpu.dot_dimension_numbers<[1], [0], [0], [1], [0, 0, 1, 1], [], []>} : vector<16x128xbf16>, vector<128x128xbf16>, vector<16x128xf32> -> vector<16x128xf32>
    %c1_30 = arith.constant 1 : index
    %c0_31 = arith.constant 0 : index
    %c0_32 = arith.constant 0 : index
    %30 = vector.load %arg3[%c1_30, %c0_31, %c0_32] : memref<3x128x128xbf16, #tpu.memory_space<vmem>>, vector<1x128x128xbf16>
    %31 = vector.shape_cast %30 : vector<1x128x128xbf16> to vector<128x128xbf16>
    %cst_33 = arith.constant dense<0.000000e+00> : vector<16x128xf32>
    %32 = tpu.matmul %26, %31, %cst_33 {dimension_numbers = #tpu.dot_dimension_numbers<[1], [0], [0], [1], [0, 0, 1, 1], [], []>} : vector<16x128xbf16>, vector<128x128xbf16>, vector<16x128xf32> -> vector<16x128xf32>
    %c2_34 = arith.constant 2 : index
    %c0_35 = arith.constant 0 : index
    %c0_36 = arith.constant 0 : index
    %33 = vector.load %arg3[%c2_34, %c0_35, %c0_36] : memref<3x128x128xbf16, #tpu.memory_space<vmem>>, vector<1x128x128xbf16>
    %34 = vector.shape_cast %33 : vector<1x128x128xbf16> to vector<128x128xbf16>
    %cst_37 = arith.constant dense<0.000000e+00> : vector<16x128xf32>
    %35 = tpu.matmul %26, %34, %cst_37 {dimension_numbers = #tpu.dot_dimension_numbers<[1], [0], [0], [1], [0, 0, 1, 1], [], []>} : vector<16x128xbf16>, vector<128x128xbf16>, vector<16x128xf32> -> vector<16x128xf32>
    %c0_38 = arith.constant 0 : index
    %c0_39 = arith.constant 0 : index
    %36 = vector.load %arg7[%c0_38, %c0_39] : memref<16x128xf32, #tpu.memory_space<vmem>>, vector<16x128xf32>
    tpu.vector_store %arg7[%c0_38, %c0_39], %32 {strides = array<i32>} : memref<16x128xf32, #tpu.memory_space<vmem>>, vector<16x128xf32>,
    %c1_40 = arith.constant 1 : index
    %c0_41 = arith.constant 0 : index
    %37 = vector.load %arg7[%c1_40, %c0_41] : memref<16x128xf32, #tpu.memory_space<vmem>>, vector<15x128xf32>
    %38 = vector.extract_strided_slice %29 {offsets = [0, 0], sizes = [15, 128], strides = [1, 1]} : vector<16x128xf32> to vector<15x128xf32>
    %39 = arith.addf %37, %38 : vector<15x128xf32>
    %c1_42 = arith.constant 1 : index
    %c0_43 = arith.constant 0 : index
    %40 = vector.load %arg7[%c1_42, %c0_43] : memref<16x128xf32, #tpu.memory_space<vmem>>, vector<15x128xf32>
    tpu.vector_store %arg7[%c1_42, %c0_43], %39 {strides = array<i32>} : memref<16x128xf32, #tpu.memory_space<vmem>>, vector<15x128xf32>,
    %c0_44 = arith.constant 0 : index
    %c0_45 = arith.constant 0 : index
    %41 = vector.load %arg7[%c0_44, %c0_45] : memref<16x128xf32, #tpu.memory_space<vmem>>, vector<15x128xf32>
    %42 = vector.extract_strided_slice %35 {offsets = [1, 0], sizes = [15, 128], strides = [1, 1]} : vector<16x128xf32> to vector<15x128xf32>
    %43 = arith.addf %41, %42 : vector<15x128xf32>
    %c0_46 = arith.constant 0 : index
    %c0_47 = arith.constant 0 : index
    %44 = vector.load %arg7[%c0_46, %c0_47] : memref<16x128xf32, #tpu.memory_space<vmem>>, vector<15x128xf32>
    tpu.vector_store %arg7[%c0_46, %c0_47], %43 {strides = array<i32>} : memref<16x128xf32, #tpu.memory_space<vmem>>, vector<15x128xf32>,
    %c0_48 = arith.constant 0 : index
    %c0_49 = arith.constant 0 : index
    %45 = vector.load %arg7[%c0_48, %c0_49] : memref<16x128xf32, #tpu.memory_space<vmem>>, vector<16x128xf32>
    %c0_50 = arith.constant 0 : index
    %c0_51 = arith.constant 0 : index
    %46 = vector.load %arg5[%c0_50, %c0_51] : memref<1x128xf32, #tpu.memory_space<vmem>>, vector<1x128xf32>
    %47 = vector.broadcast %46 : vector<1x128xf32> to vector<16x128xf32>
    %48 = arith.addf %45, %47 : vector<16x128xf32>
    %cst_52 = arith.constant 0.000000e+00 : f32
    %49 = vector.broadcast %cst_52 : f32 to vector<16x128xf32>
    %50 = arith.maximumf %48, %49 : vector<16x128xf32>
    %c0_53 = arith.constant 0 : index
    %c0_54 = arith.constant 0 : index
    %c0_55 = arith.constant 0 : index
    %51 = vector.load %arg6[%c0_53, %c0_54, %c0_55] : memref<1x16x128xf32, #tpu.memory_space<vmem>>, vector<1x16x128xf32>
    %52 = vector.shape_cast %51 : vector<1x16x128xf32> to vector<16x128xf32>
    %53 = vector.shape_cast %50 : vector<16x128xf32> to vector<1x16x128xf32>
    tpu.vector_store %arg6[%c0_53, %c0_54, %c0_55], %53 {strides = array<i32>} : memref<1x16x128xf32, #tpu.memory_space<vmem>>, vector<1x16x128xf32>,
    return
  }
  func.func @transform_0(%arg0: i32) -> (i32, i32, i32) {
    %c0_i32 = arith.constant 0 : i32
    %c0_i32_0 = arith.constant 0 : i32
    %c0_i32_1 = arith.constant 0 : i32
    return %arg0, %c0_i32, %c0_i32_0 : i32, i32, i32
  }
  func.func @transform_1(%arg0: i32) -> (i32, i32, i32) {
    %c0_i32 = arith.constant 0 : i32
    %c0_i32_0 = arith.constant 0 : i32
    %c0_i32_1 = arith.constant 0 : i32
    %c0_i32_2 = arith.constant 0 : i32
    return %c0_i32, %c0_i32_0, %c0_i32_1 : i32, i32, i32
  }
  func.func @transform_2(%arg0: i32) -> (i32, i32, i32) {
    %c0_i32 = arith.constant 0 : i32
    %c0_i32_0 = arith.constant 0 : i32
    %c0_i32_1 = arith.constant 0 : i32
    %c0_i32_2 = arith.constant 0 : i32
    return %c0_i32, %c0_i32_0, %c0_i32_1 : i32, i32, i32
  }
  func.func @transform_3(%arg0: i32) -> (i32, i32) {
    %c0_i32 = arith.constant 0 : i32
    %c0_i32_0 = arith.constant 0 : i32
    %c0_i32_1 = arith.constant 0 : i32
    return %c0_i32, %c0_i32_0 : i32, i32
  }
  func.func @transform_4(%arg0: i32) -> (i32, i32) {
    %c0_i32 = arith.constant 0 : i32
    %c0_i32_0 = arith.constant 0 : i32
    %c0_i32_1 = arith.constant 0 : i32
    return %c0_i32, %c0_i32_0 : i32, i32
  }
  func.func @transform_5(%arg0: i32) -> (i32, i32, i32) {
    %c0_i32 = arith.constant 0 : i32
    %c0_i32_0 = arith.constant 0 : i32
    %c0_i32_1 = arith.constant 0 : i32
    return %arg0, %c0_i32, %c0_i32_0 : i32, i32, i32
  }
}

</mosaic_0001>

<bundles_post_ra>
// kernel: inconv_forward.1
= control target key start
LH: loop header
LB: loop body
LE: loop exit
PB: predicated region body
PF: predicated region fallthrough
CT: control target
= control target key end

     0   :  { %s1396_s18 = smov 0   ;;  %s1629_s0 = inlined_call_operand.vmem [shape: bf16[2,16,128], index: 0, kind: input, shape index: {}]   ;;  %s1630_s1 = inlined_call_operand.vmem [shape: bf16[3,128,128], index: 1, kind: input, shape index: {}]   ;;  %s1631_s2 = inlined_call_operand.vmem [shape: bf16[3,128,128], index: 2, kind: input, shape index: {}]   ;;  %s1632_s3 = inlined_call_operand.vmem [shape: f32[1,128], index: 3, kind: input, shape index: {}]   ;;  %s1633_s4 = inlined_call_operand.vmem [shape: f32[1,128], index: 4, kind: input, shape index: {}]   ;;  %s1634_s5 = inlined_call_operand.vmem [shape: f32[2,16,128], index: 5, kind: output, shape index: {}]  }
   0x1 LB: > { %s995_s19 = sadd.s32 4294967295, %s1362_s18   ;;  %p999_p0 = scmp.ge.s32.totalorder %s1362_s18, 1  ;;  %s1362_s18 = sphi %s1396_s18, %s15_s18  }
   0x2   : > { %p187_p1 = scmp.lt.s32.totalorder %s1362_s18, 3 }
   0x4   : > { %p188_p2 = pnand %p999_p0, %p187_p1 }
   0x5   : > { %v1307_v0 = vld [vmem:[%s1630_s1] sm:$0xff] (!%p188_p2)   ;;  %v1364_v1 = vmov (!%p188_p2), 0.0   ;;  %v1309_v3 = vld [vmem:[%s1630_s1 + $0x8] sm:$0xff] (!%p188_p2)   ;;  %vm1365_vm0 = vmmov (!%p188_p2), 0   ;;  %p215_p3 = scmp.lt.s32.totalorder (!%p188_p2), %s995_s19, 1  ;;  %v1311_v5 = vld [vmem:[%s1630_s1 + $0x10] sm:$0xff] (!%p188_p2)  }
   0x6   : > { %191 = sbr.rel (%p188_p2) target bundleno = 565 (0x235), region = 40  ;;  %1177 = vmatprep.subr.bf16.mxu0 (!%p188_p2), %v1364_v1  ;;  %1197 = vmatprep.subr.bf16.mxu1 (!%p188_p2), %v1364_v1  ;;  %v1308_v2 = vld [vmem:[%s1630_s1 + $0x40] sm:$0xff] (!%p188_p2)   ;;  %v1310_v4 = vld [vmem:[%s1630_s1 + $0x48] sm:$0xff] (!%p188_p2)   ;;  %v1312_v6 = vld [vmem:[%s1630_s1 + $0x50] sm:$0xff] (!%p188_p2)   ;;  %vm563_vm1 = vcmask (!%p188_p2), 1046528  }
   0x7   : > { %1178 = vmatpush3.bf16.msra.mxu0 (!%p188_p2), %v1307_v0  ;;  %1193 = vmatprep.mubr.msk.bf16.mxu0 (!%p188_p2), %vm1365_vm0, %v1364_v1  ;;  %v1313_v7 = vld [vmem:[%s1630_s1 + $0x18] sm:$0xff] (!%p188_p2)   ;;  %v1315_v9 = vld [vmem:[%s1630_s1 + $0x20] sm:$0xff] (!%p188_p2)   ;;  %v1317_v11 = vld [vmem:[%s1630_s1 + $0x28] sm:$0xff] (!%p188_p2)  }
   0x8   : > { %1198 = vmatpush3.bf16.msra.mxu1 (!%p188_p2), %v1308_v2  ;;  %1179 = vmatprep.subr.bf16.mxu0 (!%p188_p2), %v1364_v1  ;;  %v1314_v8 = vld [vmem:[%s1630_s1 + $0x58] sm:$0xff] (!%p188_p2)   ;;  %v1316_v10 = vld [vmem:[%s1630_s1 + $0x60] sm:$0xff] (!%p188_p2)   ;;  %v1318_v12 = vld [vmem:[%s1630_s1 + $0x68] sm:$0xff] (!%p188_p2)  }
   0x9   : > { %1199 = vmatprep.subr.bf16.mxu1 (!%p188_p2), %v1364_v1  ;;  %1213 = vmatprep.mubr.msk.bf16.mxu1 (!%p188_p2), %vm1365_vm0, %v1364_v1  ;;  %v1319_v13 = vld [vmem:[%s1630_s1 + $0x30] sm:$0xff] (!%p188_p2)   ;;  %v1321_v15 = vld [vmem:[%s1630_s1 + $0x38] sm:$0xff] (!%p188_p2)   ;;  %v1324_v18 = vld [vmem:[%s1630_s1 + $0x80] sm:$0xff] (!%p188_p2)  }
   0xa   : > { %v1320_v14 = vld [vmem:[%s1630_s1 + $0x70] sm:$0xff] (!%p188_p2)   ;;  %v1322_v16 = vld [vmem:[%s1630_s1 + $0x78] sm:$0xff] (!%p188_p2)   ;;  %v1325_v19 = vld [vmem:[%s1630_s1 + $0x88] sm:$0xff] (!%p188_p2)  }
   0xb   : > { %1180 = vmatpush3.bf16.msra.mxu0 (!%p188_p2), %v1309_v3  ;;  %v1326_v20 = vld [vmem:[%s1630_s1 + $0x90] sm:$0xff] (!%p188_p2)   ;;  %v1327_v21 = vld [vmem:[%s1630_s1 + $0x98] sm:$0xff] (!%p188_p2)   ;;  %v1328_v22 = vld [vmem:[%s1630_s1 + $0xa0] sm:$0xff] (!%p188_p2)  }
   0xc   : > { %1200 = vmatpush3.bf16.msra.mxu1 (!%p188_p2), %v1310_v4  ;;  %1181 = vmatprep.subr.bf16.mxu0 (!%p188_p2), %v1364_v1  ;;  %v1329_v23 = vld [vmem:[%s1630_s1 + $0xa8] sm:$0xff] (!%p188_p2)   ;;  %v1330_v24 = vld [vmem:[%s1630_s1 + $0xb0] sm:$0xff] (!%p188_p2)   ;;  %v1331_v25 = vld [vmem:[%s1630_s1 + $0xb8] sm:$0xff] (!%p188_p2)  }
   0xd   : > { %1201 = vmatprep.subr.bf16.mxu1 %v1364_v1  ;;  %s1636_s19 = smov (!%p215_p3, %s995_s19), 1  ;;  %v1332_v26 = vld [vmem:[%s1631_s2] sm:$0xff]   ;;  %v1334_v28 = vld [vmem:[%s1631_s2 + $0x8] sm:$0xff]   ;;  %v1336_v30 = vld [vmem:[%s1631_s2 + $0x10] sm:$0xff]  }
   0xe   : > { %s1121_s11 = sshll.u32 %s1636_s19, 3  ;;  %v1333_v27 = vld [vmem:[%s1631_s2 + $0x40] sm:$0xff]   ;;  %v1335_v29 = vld [vmem:[%s1631_s2 + $0x48] sm:$0xff]   ;;  %v1337_v31 = vld [vmem:[%s1631_s2 + $0x50] sm:$0xff]   ;;  %s1122_s7 = sshll.u32 %s1636_s19, 4 }
   0xf   : > { %1182 = vmatpush3.bf16.msra.mxu0 %v1311_v5  ;;  %s219_s20 = scalar_lea.vmem %s1629_s0, %s1121_s11  ;;  %v1338_v32 = vld [vmem:[%s1631_s2 + $0x18] sm:$0xff]   ;;  %v1340_v34 = vld [vmem:[%s1631_s2 + $0x20] sm:$0xff]   ;;  %v1342_v36 = vld [vmem:[%s1631_s2 + $0x28] sm:$0xff]   ;;  %s224_s10 = scalar_lea.vmem %s1634_s5, %s1122_s7 }
  0x10   : > { %1202 = vmatpush3.bf16.msra.mxu1 %v1312_v6  ;;  %1183 = vmatprep.subr.bf16.mxu0 %v1364_v1  ;;  %v1323_v17 = vld [vmem:[%s219_s20] sm:$0xff]   ;;  %v1339_v33 = vld [vmem:[%s1631_s2 + $0x58] sm:$0xff]   ;;  %v1343_v37 = vld [vmem:[%s1631_s2 + $0x68] sm:$0xff]  }
  0x11   : > { %1203 = vmatprep.subr.bf16.mxu1 %v1364_v1  ;;  %v1341_v35 = vld [vmem:[%s1631_s2 + $0x60] sm:$0xff]   ;;  %v1344_v38 = vld [vmem:[%s1631_s2 + $0x30] sm:$0xff]   ;;  %v1346_v40 = vld [vmem:[%s1631_s2 + $0x38] sm:$0xff]  }
  0x12   : > { %v1345_v39 = vld [vmem:[%s1631_s2 + $0x70] sm:$0xff]   ;;  %v1347_v41 = vld [vmem:[%s1631_s2 + $0x78] sm:$0xff]   ;;  %v1061_v2 = vld [vmem:[%s1632_s3] ss:$0 sm:$0xff] }
  0x13   : > { %1184 = vmatpush3.bf16.msra.mxu0 %v1313_v7 }
  0x14   : > { %1204 = vmatpush3.bf16.msra.mxu1 %v1314_v8  ;;  %1185 = vmatprep.subr.bf16.mxu0 %v1364_v1  ;;  %v1348_v8 = vld [vmem:[%s1631_s2 + $0x80] sm:$0xff]  }
  0x15   : > { %1205 = vmatprep.subr.bf16.mxu1 %v1364_v1 }
  0x17   : > { %1186 = vmatpush3.bf16.msra.mxu0 %v1315_v9 }
  0x18   : > { %1206 = vmatpush3.bf16.msra.mxu1 %v1316_v10  ;;  %1187 = vmatprep.subr.bf16.mxu0 %v1364_v1  ;;  %v1349_v10 = vld [vmem:[%s1631_s2 + $0x88] sm:$0xff]  }
  0x19   : > { %1207 = vmatprep.subr.bf16.mxu1 %v1364_v1 }
  0x1b   : > { %1188 = vmatpush3.bf16.msra.mxu0 %v1317_v11  ;;  %v1350_v11 = vld [vmem:[%s1631_s2 + $0x90] sm:$0xff]  }
  0x1c   : > { %1208 = vmatpush3.bf16.msra.mxu1 %v1318_v12  ;;  %1189 = vmatprep.subr.bf16.mxu0 %v1364_v1  ;;  %v1351_v12 = vld [vmem:[%s1631_s2 + $0x98] sm:$0xff]  }
  0x1d   : > { %1209 = vmatprep.subr.bf16.mxu1 %v1364_v1 }
  0x1f   : > { %1190 = vmatpush3.bf16.msra.mxu0 %v1319_v13  ;;  %v1352_v13 = vld [vmem:[%s1631_s2 + $0xa0] sm:$0xff]  }
  0x20   : > { %1210 = vmatpush3.bf16.msra.mxu1 %v1320_v14  ;;  %1191 = vmatprep.subr.bf16.mxu0 %v1364_v1  ;;  %v1353_v14 = vld [vmem:[%s1631_s2 + $0xa8] sm:$0xff]  }
  0x21   : > { %1211 = vmatprep.subr.bf16.mxu1 %v1364_v1 }
  0x23   : > { %1192 = vmatpush3.bf16.msra.mxu0 %v1321_v15  ;;  %v1354_v15 = vld [vmem:[%s1631_s2 + $0xb0] sm:$0xff]  }
  0x24   : > { %1212 = vmatpush3.bf16.msra.mxu1 %v1322_v16  ;;  %1217 = vmatprep.subr.bf16.mxu0 %v1364_v1  ;;  %v1355_v16 = vld [vmem:[%s1631_s2 + $0xb8] sm:$0xff]  }
  0x25   : > { %1237 = vmatprep.subr.bf16.mxu1 %v1364_v1 }
  0x26   : > { %1194 = vmatmul.mubr.bf16.vlgmr.msra.gmra.mrb[0].mxu0 %v1323_v17 }
  0x27   : > { %1214 = vmatmul.mubr.bf16.vlgmr.msra.gmra.mrb[0].mxu1 %v1323_v17  ;;  %1218 = vmatpush3.bf16.msra.mxu0 %v1324_v18 }
  0x28   : > { %1219 = vmatprep.subr.bf16.mxu0 %v1364_v1  ;;  %1233 = vmatprep.mubr.msk.bf16.mxu0 %vm1365_vm0, %v1364_v1 }
  0x29   : > { %1253 = vmatprep.mubr.msk.bf16.mxu1 %vm1365_vm0, %v1364_v1  ;;  %1238 = vmatpush3.bf16.msra.mxu1 %v1332_v26 }
  0x2a   : > { %1239 = vmatprep.subr.bf16.mxu1 %v1364_v1 }
  0x2b   : > { %1220 = vmatpush3.bf16.msra.mxu0 %v1325_v19 }
  0x2c   : > { %1221 = vmatprep.subr.bf16.mxu0 %v1364_v1 }
  0x2d   : > { %1240 = vmatpush3.bf16.msra.mxu1 %v1334_v28 }
  0x2e   : > { %1241 = vmatprep.subr.bf16.mxu1 %v1364_v1 }
  0x2f   : > { %1222 = vmatpush3.bf16.msra.mxu0 %v1326_v20 }
  0x30   : > { %1223 = vmatprep.subr.bf16.mxu0 %v1364_v1 }
  0x31   : > { %1242 = vmatpush3.bf16.msra.mxu1 %v1336_v30 }
  0x32   : > { %1243 = vmatprep.subr.bf16.mxu1 %v1364_v1 }
  0x33   : > { %1224 = vmatpush3.bf16.msra.mxu0 %v1327_v21 }
  0x34   : > { %1225 = vmatprep.subr.bf16.mxu0 %v1364_v1 }
  0x35   : > { %1244 = vmatpush3.bf16.msra.mxu1 %v1338_v32 }
  0x36   : > { %1245 = vmatprep.subr.bf16.mxu1 %v1364_v1 }
  0x37   : > { %1226 = vmatpush3.bf16.msra.mxu0 %v1328_v22 }
  0x38   : > { %1227 = vmatprep.subr.bf16.mxu0 %v1364_v1 }
  0x39   : > { %1246 = vmatpush3.bf16.msra.mxu1 %v1340_v34 }
  0x3a   : > { %1247 = vmatprep.subr.bf16.mxu1 %v1364_v1 }
  0x3b   : > { %1228 = vmatpush3.bf16.msra.mxu0 %v1329_v23 }
  0x3c   : > { %1229 = vmatprep.subr.bf16.mxu0 %v1364_v1 }
  0x3d   : > { %1248 = vmatpush3.bf16.msra.mxu1 %v1342_v36 }
  0x3e   : > { %1249 = vmatprep.subr.bf16.mxu1 %v1364_v1 }
  0x3f   : > { %1230 = vmatpush3.bf16.msra.mxu0 %v1330_v24 }
  0x40   : > { %1231 = vmatprep.subr.bf16.mxu0 %v1364_v1 }
  0x41   : > { %1250 = vmatpush3.bf16.msra.mxu1 %v1344_v38  ;;  %v1118_v38 = vld [vmem:[%s1633_s4] ss:$0 sm:$0xff] }
  0x42   : > { %1251 = vmatprep.subr.bf16.mxu1 %v1364_v1 }
  0x43   : > { %1232 = vmatpush3.bf16.msra.mxu0 %v1331_v25 }
  0x44   : > { %1257 = vmatprep.subr.bf16.mxu0 %v1364_v1 }
  0x45   : > { %1252 = vmatpush3.bf16.msra.mxu1 %v1346_v40 }
  0x46   : > { %1234 = vmatmul.mubr.bf16.vlgmr.msra.gmra.mrb[4].mxu0 %v1323_v17  ;;  %1277 = vmatprep.subr.bf16.mxu1 %v1364_v1 }
  0x47   : > { %1273 = vmatprep.mubr.msk.bf16.mxu0 %vm1365_vm0, %v1364_v1  ;;  %1258 = vmatpush3.bf16.msra.mxu0 %v1333_v27 }
  0x48   : > { %1259 = vmatprep.subr.bf16.mxu0 %v1364_v1 }
  0x4b   : > { %1260 = vmatpush3.bf16.msra.mxu0 %v1335_v29 }
  0x4c   : > { %1261 = vmatprep.subr.bf16.mxu0 %v1364_v1 }
  0x4f   : > { %1262 = vmatpush3.bf16.msra.mxu0 %v1337_v31 }
  0x50   : > { %1263 = vmatprep.subr.bf16.mxu0 %v1364_v1 }
  0x53   : > { %1264 = vmatpush3.bf16.msra.mxu0 %v1339_v33 }
  0x54   : > { %1265 = vmatprep.subr.bf16.mxu0 %v1364_v1 }
  0x57   : > { %1266 = vmatpush3.bf16.msra.mxu0 %v1341_v35 }
  0x58   : > { %1267 = vmatprep.subr.bf16.mxu0 %v1364_v1 }
  0x5b   : > { %1268 = vmatpush3.bf16.msra.mxu0 %v1343_v37 }
  0x5c   : > { %1269 = vmatprep.subr.bf16.mxu0 %v1364_v1 }
  0x5f   : > { %1270 = vmatpush3.bf16.msra.mxu0 %v1345_v39 }
  0x60   : > { %1271 = vmatprep.subr.bf16.mxu0 %v1364_v1 }
  0x63   : > { %1272 = vmatpush3.bf16.msra.mxu0 %v1347_v41 }
  0xf9   : > { %v332_v42 = vpop.f32.mrb[0].mxu0 }
  0xfa   : > { %v438_v43 = vpop.f32.mrb[0].mxu1  ;;  %v1195_v44 = vpop.f32.mrb[1].mxu0 }
  0xfb   : > { %551 = vst [vmem:[#allocation2] sm:$0xff] %v438_v43  ;;  %v1215_v45 = vpop.f32.mrb[1].mxu1  ;;  %v335_v46 = vpop.f32.mrb[2].mxu0 }
  0xfc   : > { %v441_v47 = vpop.f32.mrb[2].mxu1  ;;  %v1196_v48 = vpop.f32.mrb[3].mxu0 }
  0xfd   : > { %552 = vst [vmem:[#allocation2 + $0x8] sm:$0xff] %v441_v47  ;;  %v1216_v49 = vpop.f32.mrb[3].mxu1 }
 0x104   : > { %v553_v50 = vld [vmem:[#allocation2 + $0x1] sm:$0xff]  ;;  %v554_v51 = vld [vmem:[#allocation2 + $0x9] sm:$0x7f] }
 0x105   : > { %v555_v52 = vadd.f32 %v553_v50, %v332_v42  ;;  %v556_v53 = vadd.f32 %v554_v51, %v335_v46 }
 0x107   : > { %557 = vst [vmem:[#allocation2 + $0x1] sm:$0xff] %v555_v52  ;;  %558 = vst [vmem:[#allocation2 + $0x9] sm:$0x7f] %v556_v53 }
 0x10e   : > { %v560_v60 = vld [vmem:[#allocation2 + $0x8] sm:$0x7f]  ;;  %v559_v63 = vld [vmem:[#allocation2] sm:$0xff] }
 0x119   : > { %v544_v54 = vpop.f32.mrb[4].mxu0 }
 0x11a   : > { %v1235_v55 = vpop.f32.mrb[5].mxu0  ;;  %v564_v57 = vrot.slane %v544_v54, 1 }
 0x11b   : > { %v547_v56 = vpop.f32.mrb[6].mxu0 }
 0x11c   : > { %v565_v58 = vrot.slane %v547_v56, 1  ;;  %v1236_v59 = vpop.f32.mrb[7].mxu0 }
 0x11e   : > { %v566_v61 = vsel %vm563_vm1, %v564_v57, %v565_v58  ;;  %v570_v62 = vadd.f32 %v565_v58, %v560_v60 }
 0x11f   : > { %v569_v0 = vadd.f32 %v566_v61, %v559_v63 }
 0x120   : > { %572 = vst [vmem:[#allocation2 + $0x8] sm:$0x7f] %v570_v62 }
 0x121   : > { %v582_v3 = vadd.f32 %v1061_v2, %v569_v0 }
 0x123   : > { %v584_v6 = vmax.f32 %v582_v3, 0.0 }
 0x127   : > { %v574_v4 = vld [vmem:[#allocation2 + $0x8] sm:$0xff] }
 0x128   : > { %v583_v5 = vadd.f32 %v1061_v2, %v574_v4 }
 0x12a   : > { %v585_v7 = vmax.f32 %v583_v5, 0.0 }
 0x12c   : > { %v586_v9 = vpack.c.bf16 %v585_v7, %v584_v6 }
 0x12e   : > { %1254 = vmatmul.mubr.bf16.vlgmr.msra.gmra.mrb[4].mxu1 %v586_v9  ;;  %1274 = vmatmul.mubr.bf16.vlgmr.msra.gmra.mrb[8].mxu0 %v586_v9 }
 0x12f   : > { %1278 = vmatpush3.bf16.msra.mxu1 %v1348_v8  ;;  %1293 = vmatprep.mubr.msk.bf16.mxu1 %vm1365_vm0, %v1364_v1 }
 0x130   : > { %1279 = vmatprep.subr.bf16.mxu1 %v1364_v1 }
 0x133   : > { %1280 = vmatpush3.bf16.msra.mxu1 %v1349_v10 }
 0x134   : > { %1281 = vmatprep.subr.bf16.mxu1 %v1364_v1 }
 0x137   : > { %1282 = vmatpush3.bf16.msra.mxu1 %v1350_v11 }
 0x138   : > { %1283 = vmatprep.subr.bf16.mxu1 %v1364_v1 }
 0x13b   : > { %1284 = vmatpush3.bf16.msra.mxu1 %v1351_v12 }
 0x13c   : > { %1285 = vmatprep.subr.bf16.mxu1 %v1364_v1 }
 0x13f   : > { %1286 = vmatpush3.bf16.msra.mxu1 %v1352_v13 }
 0x140   : > { %1287 = vmatprep.subr.bf16.mxu1 %v1364_v1 }
 0x143   : > { %1288 = vmatpush3.bf16.msra.mxu1 %v1353_v14 }
 0x144   : > { %1289 = vmatprep.subr.bf16.mxu1 %v1364_v1 }
 0x147   : > { %1290 = vmatpush3.bf16.msra.mxu1 %v1354_v15 }
 0x148   : > { %1291 = vmatprep.subr.bf16.mxu1 %v1364_v1 }
 0x14b   : > { %1292 = vmatpush3.bf16.msra.mxu1 %v1355_v16 }
 0x14e   : > { %1294 = vmatmul.mubr.bf16.vlgmr.msra.gmra.mrb[8].mxu1 %v586_v9 }
 0x201   : > { %v685_v17 = vpop.f32.mrb[4].mxu1  ;;  %v791_v18 = vpop.f32.mrb[8].mxu0 }
 0x202   : > { %904 = vst [vmem:[#allocation2] sm:$0xff] %v791_v18  ;;  %v1255_v19 = vpop.f32.mrb[5].mxu1  ;;  %v1275_v20 = vpop.f32.mrb[9].mxu0 }
 0x203   : > { %v688_v21 = vpop.f32.mrb[6].mxu1  ;;  %v794_v22 = vpop.f32.mrb[10].mxu0 }
 0x204   : > { %905 = vst [vmem:[#allocation2 + $0x8] sm:$0xff] %v794_v22  ;;  %v1256_v23 = vpop.f32.mrb[7].mxu1  ;;  %v1276_v24 = vpop.f32.mrb[11].mxu0 }
 0x20b   : > { %v906_v25 = vld [vmem:[#allocation2 + $0x1] sm:$0xff]  ;;  %v907_v26 = vld [vmem:[#allocation2 + $0x9] sm:$0x7f] }
 0x20c   : > { %v908_v27 = vadd.f32 %v906_v25, %v685_v17  ;;  %v909_v28 = vadd.f32 %v907_v26, %v688_v21 }
 0x20e   : > { %910 = vst [vmem:[#allocation2 + $0x1] sm:$0xff] %v908_v27  ;;  %911 = vst [vmem:[#allocation2 + $0x9] sm:$0x7f] %v909_v28 }
 0x215   : > { %v913_v34 = vld [vmem:[#allocation2 + $0x8] sm:$0x7f]  ;;  %v912_v35 = vld [vmem:[#allocation2] sm:$0xff] }
 0x221   : > { %v897_v1 = vpop.f32.mrb[8].mxu1 }
 0x222   : > { %v1295_v29 = vpop.f32.mrb[9].mxu1  ;;  %v916_v31 = vrot.slane %v897_v1, 1 }
 0x223   : > { %v900_v30 = vpop.f32.mrb[10].mxu1 }
 0x224   : > { %v917_v32 = vrot.slane %v900_v30, 1  ;;  %v1296_v33 = vpop.f32.mrb[11].mxu1 }
 0x226   : > { %v918_v36 = vsel %vm563_vm1, %v916_v31, %v917_v32  ;;  %v922_v37 = vadd.f32 %v917_v32, %v913_v34 }
 0x227   : > { %v921_v39 = vadd.f32 %v918_v36, %v912_v35 }
 0x228   : > { %924 = vst [vmem:[#allocation2 + $0x8] sm:$0x7f] %v922_v37 }
 0x229   : > { %923 = vst [vmem:[#allocation2] sm:$0xff] %v921_v39  ;;  %v934_v40 = vadd.f32 %v1118_v38, %v921_v39 }
 0x22b   : > { %v936_v41 = vmax.f32 %v934_v40, 0.0 }
 0x22d   : > { %938 = vst [vmem:[%s224_s10] sm:$0xff] %v936_v41 }
 0x22f   : > { %v926_v42 = vld [vmem:[#allocation2 + $0x8] sm:$0xff] }
 0x230   : > { %v935_v43 = vadd.f32 %v1118_v38, %v926_v42 }
 0x232   : > { %v937_v44 = vmax.f32 %v935_v43, 0.0 }
 0x234   : > { %939 = vst [vmem:[%s224_s10 + $0x8] sm:$0xff] %v937_v44 }
 0x235 PF: > { %s15_s18 = sadd.s32 1, %s1362_s18  }
 0x236   : > { %p12_p4 = scmp.ge.s32.totalorder %s15_s18, 4  }
 0x238   :  { %14 = sbr.rel (!%p12_p4) target bundleno = 1 (0x1), region = 74 }

</bundles_post_ra>
